<compile_context>
chip_gen: v7x
topology: tpu7x:2x2x1
jax: 0.10.0
libtpu: 0.0.40
codegen_flags: <defaults>
</compile_context>

<pallas_src>
import jax
import jax.numpy as jnp
from jax.experimental import pallas as pl
from jax.experimental.pallas import tpu as pltpu


_NSEM = 8  # DMA-semaphore ring depth == max in-flight row copies


def _round_up(x, m):
    return ((x + m - 1) // m) * m


# ---------------------------------------------------------------------------
# Kernel factory: manual DMA gather of `tile_rows` table rows per grid step.
# ---------------------------------------------------------------------------
def _make_gather_kernel(tile_rows):
    assert tile_rows >= _NSEM and tile_rows % _NSEM == 0

    def kernel(labels_smem, table_hbm, out_ref, buf, sem):
        # labels_smem : (B_pad,) int32 in SMEM (scalar prefetch)
        # table_hbm   : (V, H) raw HBM ref (memory_space=pl.ANY)
        # out_ref     : (tile_rows, H) pipelined VMEM output block
        # buf         : (tile_rows, H) VMEM scratch, DMA destination
        # sem         : (_NSEM,) DMA semaphores
        t = pl.program_id(0)
        base = t * tile_rows

        def wait_slot(slot):
            # Dummy descriptor: the wait amount only depends on the copy shape,
            # which is identical for every row copy.
            pltpu.make_async_copy(table_hbm.at[0], buf.at[0], sem.at[slot]).wait()

        # Prime the semaphore ring (statically unrolled -- LLO visibility).
        for k in range(_NSEM):
            row = labels_smem[base + k]
            pltpu.make_async_copy(table_hbm.at[row], buf.at[k], sem.at[k]).start()

        # Steady state: recycle a slot as soon as its previous copy lands, so
        # there are always _NSEM row copies in flight.
        if tile_rows > _NSEM:
            @pl.loop(_NSEM, tile_rows)
            def _(i):
                slot = i % _NSEM
                row = labels_smem[base + i]   # SMEM read before the wait
                wait_slot(slot)
                pltpu.make_async_copy(
                    table_hbm.at[row], buf.at[i], sem.at[slot]).start()

        # Drain the last _NSEM in-flight copies.
        for s in range(_NSEM):
            wait_slot(s)

        # Single lane-dense full-tile store into the pipelined output block
        # (avoids sublane-masked per-row stores).
        out_ref[...] = buf[...]

    return kernel


# ---------------------------------------------------------------------------
# Wrapper: pure DMA gather  labels (B,) -> (B, H) rows of `table`.
# ---------------------------------------------------------------------------
def _embedding_lookup(labels, table, *, max_tile_rows=256):
    B = labels.shape[0]
    V, H = table.shape
    itemsize = jnp.dtype(table.dtype).itemsize

    # Clamp labels: the row DMA has no runtime bounds check on TPU.
    labels = jnp.clip(labels.astype(jnp.int32), 0, V - 1)

    # Rows gathered per grid step; bounded by a ~8 MiB VMEM budget
    # (output double-buffer + scratch = 3 * tile * H * itemsize) so the v7x
    # 32 MiB scoped-VMEM default is never a concern.
    vmem_budget = 8 * 1024 * 1024
    max_by_vmem = max(_NSEM, (vmem_budget // (3 * H * itemsize)) // _NSEM * _NSEM)
    tile = min(max_tile_rows, max_by_vmem, _round_up(B, _NSEM))
    tile = max(_NSEM, (tile // _NSEM) * _NSEM)

    # Pad the batch to a multiple of the tile (padding rows fetch table[0]
    # and are sliced off).
    b_pad = _round_up(B, tile)
    if b_pad != B:
        labels = jnp.concatenate(
            [labels, jnp.zeros((b_pad - B,), jnp.int32)], axis=0)

    out = pl.pallas_call(
        _make_gather_kernel(tile),
        out_shape=jax.ShapeDtypeStruct((b_pad, H), table.dtype),
        grid_spec=pltpu.PrefetchScalarGridSpec(
            num_scalar_prefetch=1,                 # labels -> SMEM
            grid=(b_pad // tile,),
            in_specs=[pl.BlockSpec(memory_space=pl.ANY)],   # table stays in HBM
            out_specs=pl.BlockSpec((tile, H), lambda t, labels_ref: (t, 0)),
            scratch_shapes=[
                pltpu.VMEM((tile, H), table.dtype),
                pltpu.SemaphoreType.DMA((_NSEM,)),
            ],
        ),
        # TODO(synk): engaging both v7x TensorCores would need CORE_PARALLEL /
        # pl.core_map; plain "parallel" is measured near-neutral, so keep the
        # safe choice here.
        compiler_params=pltpu.CompilerParams(
            dimension_semantics=("arbitrary",),
        ),
        cost_estimate=pl.CostEstimate(
            flops=0,
            transcendentals=0,
            bytes_accessed=2 * b_pad * H * itemsize,
        ),
    )(labels, table)

    return out[:B]


# ---------------------------------------------------------------------------
# Module-equivalent wrapper.
# ---------------------------------------------------------------------------
class ParallelLabelEmbedder:
    def __init__(self, num_classes, hidden_size, dropout_prob, *, key,
                 small_batch_threshold=128):
        use_cfg_embedding = int(dropout_prob > 0)
        # nn.init.normal_(std=0.02) equivalent, deterministic via `key`.
        self.embedding_table = 0.02 * jax.random.normal(
            key, (num_classes + use_cfg_embedding, hidden_size), jnp.float32
        )
        self.num_classes = num_classes
        self.dropout_prob = dropout_prob
        self.small_batch_threshold = small_batch_threshold

    def token_drop(self, labels, force_drop_ids=None, *, rng=None):
        if force_drop_ids is None:
            if rng is None:
                raise ValueError("rng key required for random label dropout")
            # TODO(synk): the reference dist.broadcast's the drop mask across
            # the model-parallel group; a local RNG draw stands in for it here.
            drop_ids = jax.random.uniform(rng, (labels.shape[0],)) < self.dropout_prob
        else:
            drop_ids = force_drop_ids == 1
        return jnp.where(drop_ids, self.num_classes, labels)

    def __call__(self, labels, train, force_drop_ids=None, *, rng=None):
        use_dropout = self.dropout_prob > 0
        if (train and use_dropout) or (force_drop_ids is not None):
            labels = self.token_drop(labels, force_drop_ids, rng=rng)
        if labels.shape[0] < self.small_batch_threshold:
            # Tiny batches: a plain XLA gather is already at the HBM-latency
            # floor; avoid pallas_call launch overhead.
            v = self.embedding_table.shape[0]
            return jnp.take(self.embedding_table,
                            jnp.clip(labels, 0, v - 1), axis=0)
        return _embedding_lookup(labels, self.embedding_table)


# ---------------------------------------------------------------------------
# Reference check + demo.
# ---------------------------------------------------------------------------
def _reference_embed(labels, table):
    return table[labels]


if __name__ == "__main__":
    key = jax.random.PRNGKey(0)
    k_table, k_labels, k_drop = jax.random.split(key, 3)

    num_classes = 15
    hidden_size = 128
    dropout_prob = 0.1
    batch = 8

    # threshold=0 forces the Pallas path even at the tiny demo batch size.
    embedder = ParallelLabelEmbedder(
        num_classes, hidden_size, dropout_prob, key=k_table,
        small_batch_threshold=0)

    labels = jax.random.randint(k_labels, (batch,), 0, num_classes, dtype=jnp.int32)

    # Eval path (train=False): pure embedding gather through the Pallas kernel.
    emb_eval = jax.block_until_ready(embedder(labels, train=False))
    ref = _reference_embed(labels, embedder.embedding_table)
    assert emb_eval.shape == (batch, hidden_size)
    assert jnp.allclose(emb_eval, ref, atol=1e-6), "mismatch vs reference"

    # Train path with forced drops (deterministic), exercising token_drop.
    force_drop_ids = jnp.array([1, 0, 1, 0, 0, 0, 1, 0], dtype=jnp.int32)
    emb_train = jax.block_until_ready(
        embedder(labels, train=True, force_drop_ids=force_drop_ids, rng=k_drop))
    dropped_labels = jnp.where(force_drop_ids == 1, num_classes, labels)
    ref_train = _reference_embed(dropped_labels, embedder.embedding_table)
    assert jnp.allclose(emb_train, ref_train, atol=1e-6), "mismatch vs reference (drop)"

    # Non-multiple-of-8 batch exercises the padding path.
    labels_small = labels[:5]
    emb_small = jax.block_until_ready(embedder(labels_small, train=False))
    ref_small = _reference_embed(labels_small, embedder.embedding_table)
    assert emb_small.shape == (5, hidden_size)
    assert jnp.allclose(emb_small, ref_small, atol=1e-6), "mismatch vs reference (pad)"

    # Larger batch: single step with tile=24 (exercises steady-state semaphore
    # recycling) and a forced 3-step grid with 8-row tiles.
    labels_24 = jax.random.randint(jax.random.PRNGKey(1), (24,), 0, num_classes,
                                   dtype=jnp.int32)
    ref_24 = _reference_embed(labels_24, embedder.embedding_table)
    emb_24 = jax.block_until_ready(
        _embedding_lookup(labels_24, embedder.embedding_table))
    assert jnp.allclose(emb_24, ref_24, atol=1e-6), "mismatch (steady-state)"
    emb_24_steps = jax.block_until_ready(
        _embedding_lookup(labels_24, embedder.embedding_table, max_tile_rows=8))
    assert jnp.allclose(emb_24_steps, ref_24, atol=1e-6), "mismatch (multi-step grid)"

    # Small-batch fast path (default threshold) matches the kernel path.
    embedder_fast = ParallelLabelEmbedder(
        num_classes, hidden_size, dropout_prob, key=k_table)
    emb_fast = jax.block_until_ready(embedder_fast(labels, train=False))
    assert jnp.allclose(emb_fast, emb_eval, atol=1e-6), "fast path mismatch"

    print("KERNEL_OK")
</pallas_src>

<mosaic_0001>
module attributes {stable_mosaic.version = 11 : i64} {
  func.func @kernel(%arg0: i32, %arg1: memref<8xi32, #tpu.memory_space<smem>>, %arg2: memref<16x128xf32, #tpu.memory_space<any>>, %arg3: memref<8x128xf32, #tpu.memory_space<vmem>>, %arg4: memref<8x128xf32, #tpu.memory_space<vmem>>, %arg5: memref<8x!tpu.dma_semaphore, #tpu.memory_space<semaphore_mem>>) attributes {dimension_semantics = [#tpu.dimension_semantics<arbitrary>], iteration_bounds = array<i64: 1>, scalar_prefetch = 1 : i64, scratch_operands = 2 : i64, tpu.core_type = #tpu.core_type<tc>, window_params = [{}, {transform_indices = @transform_1, window_bounds = array<i64: 8, 128>}]} {
    %c8_i32 = arith.constant 8 : i32
    %0 = arith.muli %arg0, %c8_i32 : i32
    %c0_i32 = arith.constant 0 : i32
    %1 = arith.addi %0, %c0_i32 : i32
    %2 = arith.index_cast %1 : i32 to index
    %3 = memref.load %arg1[%2] : memref<8xi32, #tpu.memory_space<smem>>
    %c0_i32_0 = arith.constant 0 : i32
    %c0_i32_1 = arith.constant 0 : i32
    %c0_i32_2 = arith.constant 0 : i32
    %4 = tpu.memref_slice %arg2[%3, %c0_i32_2] : memref<16x128xf32, #tpu.memory_space<any>> -> memref<1x128xf32, #tpu.memory_space<any>>
    %5 = tpu.memref_squeeze %4 : memref<1x128xf32, #tpu.memory_space<any>> -> memref<128xf32, #tpu.memory_space<any>>
    %c0_i32_3 = arith.constant 0 : i32
    %6 = tpu.memref_slice %arg4[%c0_i32_0, %c0_i32_3] : memref<8x128xf32, #tpu.memory_space<vmem>> -> memref<1x128xf32, #tpu.memory_space<vmem>>
    %7 = tpu.memref_squeeze %6 : memref<1x128xf32, #tpu.memory_space<vmem>> -> memref<128xf32, #tpu.memory_space<vmem>>
    %8 = tpu.memref_slice %arg5[%c0_i32_1] : memref<8x!tpu.dma_semaphore, #tpu.memory_space<semaphore_mem>> -> memref<1x!tpu.dma_semaphore, #tpu.memory_space<semaphore_mem>>
    %9 = tpu.memref_squeeze %8 : memref<1x!tpu.dma_semaphore, #tpu.memory_space<semaphore_mem>> -> memref<!tpu.dma_semaphore, #tpu.memory_space<semaphore_mem>>
    tpu.enqueue_dma source(%5 : memref<128xf32, #tpu.memory_space<any>>) target(%7 : memref<128xf32, #tpu.memory_space<vmem>>) target_semaphore(%9 : memref<!tpu.dma_semaphore, #tpu.memory_space<semaphore_mem>>)
    %c1_i32 = arith.constant 1 : i32
    %10 = arith.addi %0, %c1_i32 : i32
    %11 = arith.index_cast %10 : i32 to index
    %12 = memref.load %arg1[%11] : memref<8xi32, #tpu.memory_space<smem>>
    %c1_i32_4 = arith.constant 1 : i32
    %c1_i32_5 = arith.constant 1 : i32
    %c0_i32_6 = arith.constant 0 : i32
    %13 = tpu.memref_slice %arg2[%12, %c0_i32_6] : memref<16x128xf32, #tpu.memory_space<any>> -> memref<1x128xf32, #tpu.memory_space<any>>
    %14 = tpu.memref_squeeze %13 : memref<1x128xf32, #tpu.memory_space<any>> -> memref<128xf32, #tpu.memory_space<any>>
    %c0_i32_7 = arith.constant 0 : i32
    %15 = tpu.memref_slice %arg4[%c1_i32_4, %c0_i32_7] : memref<8x128xf32, #tpu.memory_space<vmem>> -> memref<1x128xf32, #tpu.memory_space<vmem>>
    %16 = tpu.memref_squeeze %15 : memref<1x128xf32, #tpu.memory_space<vmem>> -> memref<128xf32, #tpu.memory_space<vmem>>
    %17 = tpu.memref_slice %arg5[%c1_i32_5] : memref<8x!tpu.dma_semaphore, #tpu.memory_space<semaphore_mem>> -> memref<1x!tpu.dma_semaphore, #tpu.memory_space<semaphore_mem>>
    %18 = tpu.memref_squeeze %17 : memref<1x!tpu.dma_semaphore, #tpu.memory_space<semaphore_mem>> -> memref<!tpu.dma_semaphore, #tpu.memory_space<semaphore_mem>>
    tpu.enqueue_dma source(%14 : memref<128xf32, #tpu.memory_space<any>>) target(%16 : memref<128xf32, #tpu.memory_space<vmem>>) target_semaphore(%18 : memref<!tpu.dma_semaphore, #tpu.memory_space<semaphore_mem>>)
    %c2_i32 = arith.constant 2 : i32
    %19 = arith.addi %0, %c2_i32 : i32
    %20 = arith.index_cast %19 : i32 to index
    %21 = memref.load %arg1[%20] : memref<8xi32, #tpu.memory_space<smem>>
    %c2_i32_8 = arith.constant 2 : i32
    %c2_i32_9 = arith.constant 2 : i32
    %c0_i32_10 = arith.constant 0 : i32
    %22 = tpu.memref_slice %arg2[%21, %c0_i32_10] : memref<16x128xf32, #tpu.memory_space<any>> -> memref<1x128xf32, #tpu.memory_space<any>>
    %23 = tpu.memref_squeeze %22 : memref<1x128xf32, #tpu.memory_space<any>> -> memref<128xf32, #tpu.memory_space<any>>
    %c0_i32_11 = arith.constant 0 : i32
    %24 = tpu.memref_slice %arg4[%c2_i32_8, %c0_i32_11] : memref<8x128xf32, #tpu.memory_space<vmem>> -> memref<1x128xf32, #tpu.memory_space<vmem>>
    %25 = tpu.memref_squeeze %24 : memref<1x128xf32, #tpu.memory_space<vmem>> -> memref<128xf32, #tpu.memory_space<vmem>>
    %26 = tpu.memref_slice %arg5[%c2_i32_9] : memref<8x!tpu.dma_semaphore, #tpu.memory_space<semaphore_mem>> -> memref<1x!tpu.dma_semaphore, #tpu.memory_space<semaphore_mem>>
    %27 = tpu.memref_squeeze %26 : memref<1x!tpu.dma_semaphore, #tpu.memory_space<semaphore_mem>> -> memref<!tpu.dma_semaphore, #tpu.memory_space<semaphore_mem>>
    tpu.enqueue_dma source(%23 : memref<128xf32, #tpu.memory_space<any>>) target(%25 : memref<128xf32, #tpu.memory_space<vmem>>) target_semaphore(%27 : memref<!tpu.dma_semaphore, #tpu.memory_space<semaphore_mem>>)
    %c3_i32 = arith.constant 3 : i32
    %28 = arith.addi %0, %c3_i32 : i32
    %29 = arith.index_cast %28 : i32 to index
    %30 = memref.load %arg1[%29] : memref<8xi32, #tpu.memory_space<smem>>
    %c3_i32_12 = arith.constant 3 : i32
    %c3_i32_13 = arith.constant 3 : i32
    %c0_i32_14 = arith.constant 0 : i32
    %31 = tpu.memref_slice %arg2[%30, %c0_i32_14] : memref<16x128xf32, #tpu.memory_space<any>> -> memref<1x128xf32, #tpu.memory_space<any>>
    %32 = tpu.memref_squeeze %31 : memref<1x128xf32, #tpu.memory_space<any>> -> memref<128xf32, #tpu.memory_space<any>>
    %c0_i32_15 = arith.constant 0 : i32
    %33 = tpu.memref_slice %arg4[%c3_i32_12, %c0_i32_15] : memref<8x128xf32, #tpu.memory_space<vmem>> -> memref<1x128xf32, #tpu.memory_space<vmem>>
    %34 = tpu.memref_squeeze %33 : memref<1x128xf32, #tpu.memory_space<vmem>> -> memref<128xf32, #tpu.memory_space<vmem>>
    %35 = tpu.memref_slice %arg5[%c3_i32_13] : memref<8x!tpu.dma_semaphore, #tpu.memory_space<semaphore_mem>> -> memref<1x!tpu.dma_semaphore, #tpu.memory_space<semaphore_mem>>
    %36 = tpu.memref_squeeze %35 : memref<1x!tpu.dma_semaphore, #tpu.memory_space<semaphore_mem>> -> memref<!tpu.dma_semaphore, #tpu.memory_space<semaphore_mem>>
    tpu.enqueue_dma source(%32 : memref<128xf32, #tpu.memory_space<any>>) target(%34 : memref<128xf32, #tpu.memory_space<vmem>>) target_semaphore(%36 : memref<!tpu.dma_semaphore, #tpu.memory_space<semaphore_mem>>)
    %c4_i32 = arith.constant 4 : i32
    %37 = arith.addi %0, %c4_i32 : i32
    %38 = arith.index_cast %37 : i32 to index
    %39 = memref.load %arg1[%38] : memref<8xi32, #tpu.memory_space<smem>>
    %c4_i32_16 = arith.constant 4 : i32
    %c4_i32_17 = arith.constant 4 : i32
    %c0_i32_18 = arith.constant 0 : i32
    %40 = tpu.memref_slice %arg2[%39, %c0_i32_18] : memref<16x128xf32, #tpu.memory_space<any>> -> memref<1x128xf32, #tpu.memory_space<any>>
    %41 = tpu.memref_squeeze %40 : memref<1x128xf32, #tpu.memory_space<any>> -> memref<128xf32, #tpu.memory_space<any>>
    %c0_i32_19 = arith.constant 0 : i32
    %42 = tpu.memref_slice %arg4[%c4_i32_16, %c0_i32_19] : memref<8x128xf32, #tpu.memory_space<vmem>> -> memref<1x128xf32, #tpu.memory_space<vmem>>
    %43 = tpu.memref_squeeze %42 : memref<1x128xf32, #tpu.memory_space<vmem>> -> memref<128xf32, #tpu.memory_space<vmem>>
    %44 = tpu.memref_slice %arg5[%c4_i32_17] : memref<8x!tpu.dma_semaphore, #tpu.memory_space<semaphore_mem>> -> memref<1x!tpu.dma_semaphore, #tpu.memory_space<semaphore_mem>>
    %45 = tpu.memref_squeeze %44 : memref<1x!tpu.dma_semaphore, #tpu.memory_space<semaphore_mem>> -> memref<!tpu.dma_semaphore, #tpu.memory_space<semaphore_mem>>
    tpu.enqueue_dma source(%41 : memref<128xf32, #tpu.memory_space<any>>) target(%43 : memref<128xf32, #tpu.memory_space<vmem>>) target_semaphore(%45 : memref<!tpu.dma_semaphore, #tpu.memory_space<semaphore_mem>>)
    %c5_i32 = arith.constant 5 : i32
    %46 = arith.addi %0, %c5_i32 : i32
    %47 = arith.index_cast %46 : i32 to index
    %48 = memref.load %arg1[%47] : memref<8xi32, #tpu.memory_space<smem>>
    %c5_i32_20 = arith.constant 5 : i32
    %c5_i32_21 = arith.constant 5 : i32
    %c0_i32_22 = arith.constant 0 : i32
    %49 = tpu.memref_slice %arg2[%48, %c0_i32_22] : memref<16x128xf32, #tpu.memory_space<any>> -> memref<1x128xf32, #tpu.memory_space<any>>
    %50 = tpu.memref_squeeze %49 : memref<1x128xf32, #tpu.memory_space<any>> -> memref<128xf32, #tpu.memory_space<any>>
    %c0_i32_23 = arith.constant 0 : i32
    %51 = tpu.memref_slice %arg4[%c5_i32_20, %c0_i32_23] : memref<8x128xf32, #tpu.memory_space<vmem>> -> memref<1x128xf32, #tpu.memory_space<vmem>>
    %52 = tpu.memref_squeeze %51 : memref<1x128xf32, #tpu.memory_space<vmem>> -> memref<128xf32, #tpu.memory_space<vmem>>
    %53 = tpu.memref_slice %arg5[%c5_i32_21] : memref<8x!tpu.dma_semaphore, #tpu.memory_space<semaphore_mem>> -> memref<1x!tpu.dma_semaphore, #tpu.memory_space<semaphore_mem>>
    %54 = tpu.memref_squeeze %53 : memref<1x!tpu.dma_semaphore, #tpu.memory_space<semaphore_mem>> -> memref<!tpu.dma_semaphore, #tpu.memory_space<semaphore_mem>>
    tpu.enqueue_dma source(%50 : memref<128xf32, #tpu.memory_space<any>>) target(%52 : memref<128xf32, #tpu.memory_space<vmem>>) target_semaphore(%54 : memref<!tpu.dma_semaphore, #tpu.memory_space<semaphore_mem>>)
    %c6_i32 = arith.constant 6 : i32
    %55 = arith.addi %0, %c6_i32 : i32
    %56 = arith.index_cast %55 : i32 to index
    %57 = memref.load %arg1[%56] : memref<8xi32, #tpu.memory_space<smem>>
    %c6_i32_24 = arith.constant 6 : i32
    %c6_i32_25 = arith.constant 6 : i32
    %c0_i32_26 = arith.constant 0 : i32
    %58 = tpu.memref_slice %arg2[%57, %c0_i32_26] : memref<16x128xf32, #tpu.memory_space<any>> -> memref<1x128xf32, #tpu.memory_space<any>>
    %59 = tpu.memref_squeeze %58 : memref<1x128xf32, #tpu.memory_space<any>> -> memref<128xf32, #tpu.memory_space<any>>
    %c0_i32_27 = arith.constant 0 : i32
    %60 = tpu.memref_slice %arg4[%c6_i32_24, %c0_i32_27] : memref<8x128xf32, #tpu.memory_space<vmem>> -> memref<1x128xf32, #tpu.memory_space<vmem>>
    %61 = tpu.memref_squeeze %60 : memref<1x128xf32, #tpu.memory_space<vmem>> -> memref<128xf32, #tpu.memory_space<vmem>>
    %62 = tpu.memref_slice %arg5[%c6_i32_25] : memref<8x!tpu.dma_semaphore, #tpu.memory_space<semaphore_mem>> -> memref<1x!tpu.dma_semaphore, #tpu.memory_space<semaphore_mem>>
    %63 = tpu.memref_squeeze %62 : memref<1x!tpu.dma_semaphore, #tpu.memory_space<semaphore_mem>> -> memref<!tpu.dma_semaphore, #tpu.memory_space<semaphore_mem>>
    tpu.enqueue_dma source(%59 : memref<128xf32, #tpu.memory_space<any>>) target(%61 : memref<128xf32, #tpu.memory_space<vmem>>) target_semaphore(%63 : memref<!tpu.dma_semaphore, #tpu.memory_space<semaphore_mem>>)
    %c7_i32 = arith.constant 7 : i32
    %64 = arith.addi %0, %c7_i32 : i32
    %65 = arith.index_cast %64 : i32 to index
    %66 = memref.load %arg1[%65] : memref<8xi32, #tpu.memory_space<smem>>
    %c7_i32_28 = arith.constant 7 : i32
    %c7_i32_29 = arith.constant 7 : i32
    %c0_i32_30 = arith.constant 0 : i32
    %67 = tpu.memref_slice %arg2[%66, %c0_i32_30] : memref<16x128xf32, #tpu.memory_space<any>> -> memref<1x128xf32, #tpu.memory_space<any>>
    %68 = tpu.memref_squeeze %67 : memref<1x128xf32, #tpu.memory_space<any>> -> memref<128xf32, #tpu.memory_space<any>>
    %c0_i32_31 = arith.constant 0 : i32
    %69 = tpu.memref_slice %arg4[%c7_i32_28, %c0_i32_31] : memref<8x128xf32, #tpu.memory_space<vmem>> -> memref<1x128xf32, #tpu.memory_space<vmem>>
    %70 = tpu.memref_squeeze %69 : memref<1x128xf32, #tpu.memory_space<vmem>> -> memref<128xf32, #tpu.memory_space<vmem>>
    %71 = tpu.memref_slice %arg5[%c7_i32_29] : memref<8x!tpu.dma_semaphore, #tpu.memory_space<semaphore_mem>> -> memref<1x!tpu.dma_semaphore, #tpu.memory_space<semaphore_mem>>
    %72 = tpu.memref_squeeze %71 : memref<1x!tpu.dma_semaphore, #tpu.memory_space<semaphore_mem>> -> memref<!tpu.dma_semaphore, #tpu.memory_space<semaphore_mem>>
    tpu.enqueue_dma source(%68 : memref<128xf32, #tpu.memory_space<any>>) target(%70 : memref<128xf32, #tpu.memory_space<vmem>>) target_semaphore(%72 : memref<!tpu.dma_semaphore, #tpu.memory_space<semaphore_mem>>)
    %c0_i32_32 = arith.constant 0 : i32
    %c0_i32_33 = arith.constant 0 : i32
    %c0_i32_34 = arith.constant 0 : i32
    %c0_i32_35 = arith.constant 0 : i32
    %73 = tpu.memref_slice %arg2[%c0_i32_32, %c0_i32_35] : memref<16x128xf32, #tpu.memory_space<any>> -> memref<1x128xf32, #tpu.memory_space<any>>
    %74 = tpu.memref_squeeze %73 : memref<1x128xf32, #tpu.memory_space<any>> -> memref<128xf32, #tpu.memory_space<any>>
    %c0_i32_36 = arith.constant 0 : i32
    %75 = tpu.memref_slice %arg4[%c0_i32_33, %c0_i32_36] : memref<8x128xf32, #tpu.memory_space<vmem>> -> memref<1x128xf32, #tpu.memory_space<vmem>>
    %76 = tpu.memref_squeeze %75 : memref<1x128xf32, #tpu.memory_space<vmem>> -> memref<128xf32, #tpu.memory_space<vmem>>
    %77 = tpu.memref_slice %arg5[%c0_i32_34] : memref<8x!tpu.dma_semaphore, #tpu.memory_space<semaphore_mem>> -> memref<1x!tpu.dma_semaphore, #tpu.memory_space<semaphore_mem>>
    %78 = tpu.memref_squeeze %77 : memref<1x!tpu.dma_semaphore, #tpu.memory_space<semaphore_mem>> -> memref<!tpu.dma_semaphore, #tpu.memory_space<semaphore_mem>>
    tpu.wait_dma2 semaphore(%78 : memref<!tpu.dma_semaphore, #tpu.memory_space<semaphore_mem>>) src(%74 : memref<128xf32, #tpu.memory_space<any>>) dst(%76 : memref<128xf32, #tpu.memory_space<vmem>>)
    %c0_i32_37 = arith.constant 0 : i32
    %c0_i32_38 = arith.constant 0 : i32
    %c1_i32_39 = arith.constant 1 : i32
    %c0_i32_40 = arith.constant 0 : i32
    %79 = tpu.memref_slice %arg2[%c0_i32_37, %c0_i32_40] : memref<16x128xf32, #tpu.memory_space<any>> -> memref<1x128xf32, #tpu.memory_space<any>>
    %80 = tpu.memref_squeeze %79 : memref<1x128xf32, #tpu.memory_space<any>> -> memref<128xf32, #tpu.memory_space<any>>
    %c0_i32_41 = arith.constant 0 : i32
    %81 = tpu.memref_slice %arg4[%c0_i32_38, %c0_i32_41] : memref<8x128xf32, #tpu.memory_space<vmem>> -> memref<1x128xf32, #tpu.memory_space<vmem>>
    %82 = tpu.memref_squeeze %81 : memref<1x128xf32, #tpu.memory_space<vmem>> -> memref<128xf32, #tpu.memory_space<vmem>>
    %83 = tpu.memref_slice %arg5[%c1_i32_39] : memref<8x!tpu.dma_semaphore, #tpu.memory_space<semaphore_mem>> -> memref<1x!tpu.dma_semaphore, #tpu.memory_space<semaphore_mem>>
    %84 = tpu.memref_squeeze %83 : memref<1x!tpu.dma_semaphore, #tpu.memory_space<semaphore_mem>> -> memref<!tpu.dma_semaphore, #tpu.memory_space<semaphore_mem>>
    tpu.wait_dma2 semaphore(%84 : memref<!tpu.dma_semaphore, #tpu.memory_space<semaphore_mem>>) src(%80 : memref<128xf32, #tpu.memory_space<any>>) dst(%82 : memref<128xf32, #tpu.memory_space<vmem>>)
    %c0_i32_42 = arith.constant 0 : i32
    %c0_i32_43 = arith.constant 0 : i32
    %c2_i32_44 = arith.constant 2 : i32
    %c0_i32_45 = arith.constant 0 : i32
    %85 = tpu.memref_slice %arg2[%c0_i32_42, %c0_i32_45] : memref<16x128xf32, #tpu.memory_space<any>> -> memref<1x128xf32, #tpu.memory_space<any>>
    %86 = tpu.memref_squeeze %85 : memref<1x128xf32, #tpu.memory_space<any>> -> memref<128xf32, #tpu.memory_space<any>>
    %c0_i32_46 = arith.constant 0 : i32
    %87 = tpu.memref_slice %arg4[%c0_i32_43, %c0_i32_46] : memref<8x128xf32, #tpu.memory_space<vmem>> -> memref<1x128xf32, #tpu.memory_space<vmem>>
    %88 = tpu.memref_squeeze %87 : memref<1x128xf32, #tpu.memory_space<vmem>> -> memref<128xf32, #tpu.memory_space<vmem>>
    %89 = tpu.memref_slice %arg5[%c2_i32_44] : memref<8x!tpu.dma_semaphore, #tpu.memory_space<semaphore_mem>> -> memref<1x!tpu.dma_semaphore, #tpu.memory_space<semaphore_mem>>
    %90 = tpu.memref_squeeze %89 : memref<1x!tpu.dma_semaphore, #tpu.memory_space<semaphore_mem>> -> memref<!tpu.dma_semaphore, #tpu.memory_space<semaphore_mem>>
    tpu.wait_dma2 semaphore(%90 : memref<!tpu.dma_semaphore, #tpu.memory_space<semaphore_mem>>) src(%86 : memref<128xf32, #tpu.memory_space<any>>) dst(%88 : memref<128xf32, #tpu.memory_space<vmem>>)
    %c0_i32_47 = arith.constant 0 : i32
    %c0_i32_48 = arith.constant 0 : i32
    %c3_i32_49 = arith.constant 3 : i32
    %c0_i32_50 = arith.constant 0 : i32
    %91 = tpu.memref_slice %arg2[%c0_i32_47, %c0_i32_50] : memref<16x128xf32, #tpu.memory_space<any>> -> memref<1x128xf32, #tpu.memory_space<any>>
    %92 = tpu.memref_squeeze %91 : memref<1x128xf32, #tpu.memory_space<any>> -> memref<128xf32, #tpu.memory_space<any>>
    %c0_i32_51 = arith.constant 0 : i32
    %93 = tpu.memref_slice %arg4[%c0_i32_48, %c0_i32_51] : memref<8x128xf32, #tpu.memory_space<vmem>> -> memref<1x128xf32, #tpu.memory_space<vmem>>
    %94 = tpu.memref_squeeze %93 : memref<1x128xf32, #tpu.memory_space<vmem>> -> memref<128xf32, #tpu.memory_space<vmem>>
    %95 = tpu.memref_slice %arg5[%c3_i32_49] : memref<8x!tpu.dma_semaphore, #tpu.memory_space<semaphore_mem>> -> memref<1x!tpu.dma_semaphore, #tpu.memory_space<semaphore_mem>>
    %96 = tpu.memref_squeeze %95 : memref<1x!tpu.dma_semaphore, #tpu.memory_space<semaphore_mem>> -> memref<!tpu.dma_semaphore, #tpu.memory_space<semaphore_mem>>
    tpu.wait_dma2 semaphore(%96 : memref<!tpu.dma_semaphore, #tpu.memory_space<semaphore_mem>>) src(%92 : memref<128xf32, #tpu.memory_space<any>>) dst(%94 : memref<128xf32, #tpu.memory_space<vmem>>)
    %c0_i32_52 = arith.constant 0 : i32
    %c0_i32_53 = arith.constant 0 : i32
    %c4_i32_54 = arith.constant 4 : i32
    %c0_i32_55 = arith.constant 0 : i32
    %97 = tpu.memref_slice %arg2[%c0_i32_52, %c0_i32_55] : memref<16x128xf32, #tpu.memory_space<any>> -> memref<1x128xf32, #tpu.memory_space<any>>
    %98 = tpu.memref_squeeze %97 : memref<1x128xf32, #tpu.memory_space<any>> -> memref<128xf32, #tpu.memory_space<any>>
    %c0_i32_56 = arith.constant 0 : i32
    %99 = tpu.memref_slice %arg4[%c0_i32_53, %c0_i32_56] : memref<8x128xf32, #tpu.memory_space<vmem>> -> memref<1x128xf32, #tpu.memory_space<vmem>>
    %100 = tpu.memref_squeeze %99 : memref<1x128xf32, #tpu.memory_space<vmem>> -> memref<128xf32, #tpu.memory_space<vmem>>
    %101 = tpu.memref_slice %arg5[%c4_i32_54] : memref<8x!tpu.dma_semaphore, #tpu.memory_space<semaphore_mem>> -> memref<1x!tpu.dma_semaphore, #tpu.memory_space<semaphore_mem>>
    %102 = tpu.memref_squeeze %101 : memref<1x!tpu.dma_semaphore, #tpu.memory_space<semaphore_mem>> -> memref<!tpu.dma_semaphore, #tpu.memory_space<semaphore_mem>>
    tpu.wait_dma2 semaphore(%102 : memref<!tpu.dma_semaphore, #tpu.memory_space<semaphore_mem>>) src(%98 : memref<128xf32, #tpu.memory_space<any>>) dst(%100 : memref<128xf32, #tpu.memory_space<vmem>>)
    %c0_i32_57 = arith.constant 0 : i32
    %c0_i32_58 = arith.constant 0 : i32
    %c5_i32_59 = arith.constant 5 : i32
    %c0_i32_60 = arith.constant 0 : i32
    %103 = tpu.memref_slice %arg2[%c0_i32_57, %c0_i32_60] : memref<16x128xf32, #tpu.memory_space<any>> -> memref<1x128xf32, #tpu.memory_space<any>>
    %104 = tpu.memref_squeeze %103 : memref<1x128xf32, #tpu.memory_space<any>> -> memref<128xf32, #tpu.memory_space<any>>
    %c0_i32_61 = arith.constant 0 : i32
    %105 = tpu.memref_slice %arg4[%c0_i32_58, %c0_i32_61] : memref<8x128xf32, #tpu.memory_space<vmem>> -> memref<1x128xf32, #tpu.memory_space<vmem>>
    %106 = tpu.memref_squeeze %105 : memref<1x128xf32, #tpu.memory_space<vmem>> -> memref<128xf32, #tpu.memory_space<vmem>>
    %107 = tpu.memref_slice %arg5[%c5_i32_59] : memref<8x!tpu.dma_semaphore, #tpu.memory_space<semaphore_mem>> -> memref<1x!tpu.dma_semaphore, #tpu.memory_space<semaphore_mem>>
    %108 = tpu.memref_squeeze %107 : memref<1x!tpu.dma_semaphore, #tpu.memory_space<semaphore_mem>> -> memref<!tpu.dma_semaphore, #tpu.memory_space<semaphore_mem>>
    tpu.wait_dma2 semaphore(%108 : memref<!tpu.dma_semaphore, #tpu.memory_space<semaphore_mem>>) src(%104 : memref<128xf32, #tpu.memory_space<any>>) dst(%106 : memref<128xf32, #tpu.memory_space<vmem>>)
    %c0_i32_62 = arith.constant 0 : i32
    %c0_i32_63 = arith.constant 0 : i32
    %c6_i32_64 = arith.constant 6 : i32
    %c0_i32_65 = arith.constant 0 : i32
    %109 = tpu.memref_slice %arg2[%c0_i32_62, %c0_i32_65] : memref<16x128xf32, #tpu.memory_space<any>> -> memref<1x128xf32, #tpu.memory_space<any>>
    %110 = tpu.memref_squeeze %109 : memref<1x128xf32, #tpu.memory_space<any>> -> memref<128xf32, #tpu.memory_space<any>>
    %c0_i32_66 = arith.constant 0 : i32
    %111 = tpu.memref_slice %arg4[%c0_i32_63, %c0_i32_66] : memref<8x128xf32, #tpu.memory_space<vmem>> -> memref<1x128xf32, #tpu.memory_space<vmem>>
    %112 = tpu.memref_squeeze %111 : memref<1x128xf32, #tpu.memory_space<vmem>> -> memref<128xf32, #tpu.memory_space<vmem>>
    %113 = tpu.memref_slice %arg5[%c6_i32_64] : memref<8x!tpu.dma_semaphore, #tpu.memory_space<semaphore_mem>> -> memref<1x!tpu.dma_semaphore, #tpu.memory_space<semaphore_mem>>
    %114 = tpu.memref_squeeze %113 : memref<1x!tpu.dma_semaphore, #tpu.memory_space<semaphore_mem>> -> memref<!tpu.dma_semaphore, #tpu.memory_space<semaphore_mem>>
    tpu.wait_dma2 semaphore(%114 : memref<!tpu.dma_semaphore, #tpu.memory_space<semaphore_mem>>) src(%110 : memref<128xf32, #tpu.memory_space<any>>) dst(%112 : memref<128xf32, #tpu.memory_space<vmem>>)
    %c0_i32_67 = arith.constant 0 : i32
    %c0_i32_68 = arith.constant 0 : i32
    %c7_i32_69 = arith.constant 7 : i32
    %c0_i32_70 = arith.constant 0 : i32
    %115 = tpu.memref_slice %arg2[%c0_i32_67, %c0_i32_70] : memref<16x128xf32, #tpu.memory_space<any>> -> memref<1x128xf32, #tpu.memory_space<any>>
    %116 = tpu.memref_squeeze %115 : memref<1x128xf32, #tpu.memory_space<any>> -> memref<128xf32, #tpu.memory_space<any>>
    %c0_i32_71 = arith.constant 0 : i32
    %117 = tpu.memref_slice %arg4[%c0_i32_68, %c0_i32_71] : memref<8x128xf32, #tpu.memory_space<vmem>> -> memref<1x128xf32, #tpu.memory_space<vmem>>
    %118 = tpu.memref_squeeze %117 : memref<1x128xf32, #tpu.memory_space<vmem>> -> memref<128xf32, #tpu.memory_space<vmem>>
    %119 = tpu.memref_slice %arg5[%c7_i32_69] : memref<8x!tpu.dma_semaphore, #tpu.memory_space<semaphore_mem>> -> memref<1x!tpu.dma_semaphore, #tpu.memory_space<semaphore_mem>>
    %120 = tpu.memref_squeeze %119 : memref<1x!tpu.dma_semaphore, #tpu.memory_space<semaphore_mem>> -> memref<!tpu.dma_semaphore, #tpu.memory_space<semaphore_mem>>
    tpu.wait_dma2 semaphore(%120 : memref<!tpu.dma_semaphore, #tpu.memory_space<semaphore_mem>>) src(%116 : memref<128xf32, #tpu.memory_space<any>>) dst(%118 : memref<128xf32, #tpu.memory_space<vmem>>)
    %c0 = arith.constant 0 : index
    %c0_72 = arith.constant 0 : index
    %121 = vector.load %arg4[%c0, %c0_72] : memref<8x128xf32, #tpu.memory_space<vmem>>, vector<8x128xf32>
    %c0_73 = arith.constant 0 : index
    %c0_74 = arith.constant 0 : index
    %122 = vector.load %arg3[%c0_73, %c0_74] : memref<8x128xf32, #tpu.memory_space<vmem>>, vector<8x128xf32>
    tpu.vector_store %arg3[%c0_73, %c0_74], %121 {strides = array<i32>} : memref<8x128xf32, #tpu.memory_space<vmem>>, vector<8x128xf32>,
    return
  }
  func.func @transform_1(%arg0: i32, %arg1: memref<8xi32, #tpu.memory_space<smem>>) -> (i32, i32) {
    %c0_i32 = arith.constant 0 : i32
    %c0_i32_0 = arith.constant 0 : i32
    return %arg0, %c0_i32 : i32, i32
  }
}

</mosaic_0001>

<bundles_post_ra>
// kernel: tpu_custom_call.1
= control target key start
LH: loop header
LB: loop body
LE: loop exit
PB: predicated region body
PF: predicated region fallthrough
CT: control target
= control target key end

     0   :  { %s703_s0 = inlined_call_operand.hbm [shape: s32[8], index: 0, kind: input, shape index: {}]   ;;  %s704_s1 = inlined_call_operand.hbm [shape: f32[16,128], index: 1, kind: input, shape index: {}]   ;;  %s705_s2 = inlined_call_operand.hbm [shape: f32[8,128], index: 2, kind: output, shape index: {}]  }
   0x1   :  { %s282_s11 = scalar_lea.hbm %s703_s0, 16 }
   0x2   :  { %p283_p0 = scmp.ne.s32.totalorder %s703_s0, %s282_s11  ;;  %p286_p1 = scmp.lt.u32.totalorder %s282_s11, %s703_s0 }
   0x4   :  { %p288_p2 = pnand %p286_p1, %p283_p0 }
   0x6   :  { %291 = shalt.err (!%p288_p2)  }
   0x7   :  { %s526_s16 = smov [#allocation5]  }
   0x8   :  { %8 = dma.hbm_to_smem %s703_s0, 16, %s526_s16, [#allocation4] }
   0x9   :  { %506 = dma.done.wait [#allocation4], 16 }
   0xa   :  { %507 = vsyncadd [#allocation4], 4294967280 }
   0xb   :  { %10 = sfence }
   0xc   :  { %11 = vsyncpa [#allocation7], 0  ;;  %s13_s19 = sld [smem:[#allocation5]]  ;;  %s527_s20 = smov [#allocation2]  }
   0xd   :  { %s23_s21 = sshll.u32 %s527_s20, 4  ;;  %s563_s22 = sld [smem:[#allocation5 + $0x1]]  ;;  %s565_s21 = int_to_ptr.vmem [resolvable:$true] %s23_s21 }
   0xe   :  { %s528_s23 = smov [#allocation2 + $0x1]   ;;  %s567_s25 = sld [smem:[#allocation5 + $0x2]] }
   0xf   :  { %s40_s24 = sshll.u32 %s528_s23, 4  ;;  %s529_s26 = smov [#allocation2 + $0x2]   ;;  %s569_s24 = int_to_ptr.vmem [resolvable:$true] %s40_s24 }
  0x10   :  { %s57_s0 = sshll.u32 %s529_s26, 4  ;;  %s571_s27 = sld [smem:[#allocation5 + $0x3]]  ;;  %s573_s0 = int_to_ptr.vmem [resolvable:$true] %s57_s0 }
  0x11   :  { %s582_s8 = scalar_lea.hbm %s704_s1, 256 }
  0x12   :  { %s249_s28 = sshll.u32 %s13_s19, 4 }
  0x13   :  { %s15_s3 = scalar_lea.hbm %s704_s1, %s249_s28  ;;  %s251_s4 = sshll.u32 %s563_s22, 4 }
  0x14   :  { %s292_s5 = scalar_lea.hbm %s15_s3, 16  ;;  %p295_p4 = scmp.lt.u32.totalorder %s15_s3, %s704_s1 }
  0x15   :  { %p293_p3 = scmp.ne.s32.totalorder %s15_s3, %s292_s5  ;;  %p296_p5 = scmp.lt.u32.totalorder %s582_s8, %s292_s5 }
  0x16   :  { %p298_p7 = scmp.lt.u32.totalorder %s292_s5, %s15_s3 }
  0x17   :  { %p297_p6 = por %p296_p5, %p295_p4 }
  0x19   :  { %p299_p8 = por %p298_p7, %p297_p6 }
  0x1b   :  { %p300_p9 = pnand %p299_p8, %p293_p3 }
  0x1d   :  { %303 = shalt.err (!%p300_p9)  }
  0x1e   :  { %s304_s11 = scalar_lea.vmem %s565_s21, 16  ;;  %s591_s12 = scalar_lea.vmem %s565_s21, 128 }
  0x1f   :  { %p305_p10 = scmp.ne.s32.totalorder %s565_s21, %s304_s11  ;;  %p309_p11 = scmp.lt.s32.totalorder %s565_s21, %s565_s21 }
  0x20   :  { %p310_p12 = scmp.lt.s32.totalorder %s591_s12, %s304_s11 }
  0x22   :  { %p311_p13 = por %p310_p12, %p309_p11 }
  0x24   :  { %p312_p0 = pnand %p311_p13, %p305_p10 }
  0x26   :  { %315 = shalt.err (!%p312_p0)  }
  0x27   :  { %26 = dma.hbm_to_vmem [thread:$0]  %s15_s3, 16, %s565_s21, [#allocation3] }
  0x28   :  { %s30_s15 = scalar_lea.hbm %s704_s1, %s251_s4  ;;  %s253_s16 = sshll.u32 %s567_s25, 4 }
  0x29   :  { %s316_s17 = scalar_lea.hbm %s30_s15, 16  ;;  %p319_p2 = scmp.lt.u32.totalorder %s30_s15, %s704_s1 }
  0x2a   :  { %p317_p1 = scmp.ne.s32.totalorder %s30_s15, %s316_s17  ;;  %p320_p3 = scmp.lt.u32.totalorder %s582_s8, %s316_s17 }
  0x2b   :  { %p322_p5 = scmp.lt.u32.totalorder %s316_s17, %s30_s15 }
  0x2c   :  { %p321_p4 = por %p320_p3, %p319_p2 }
  0x2e   :  { %p323_p6 = por %p322_p5, %p321_p4 }
  0x30   :  { %p324_p7 = pnand %p323_p6, %p317_p1 }
  0x32   :  { %327 = shalt.err (!%p324_p7)  }
  0x33   :  { %s328_s20 = scalar_lea.vmem %s569_s24, 16  ;;  %p333_p9 = scmp.lt.s32.totalorder %s569_s24, %s565_s21 }
  0x34   :  { %p329_p8 = scmp.ne.s32.totalorder %s569_s24, %s328_s20  ;;  %p334_p10 = scmp.lt.s32.totalorder %s591_s12, %s328_s20 }
  0x36   :  { %p335_p11 = por %p334_p10, %p333_p9 }
  0x38   :  { %p336_p12 = pnand %p335_p11, %p329_p8 }
  0x3a   :  { %339 = shalt.err (!%p336_p12)  }
  0x3b   :  { %43 = dma.hbm_to_vmem [thread:$0]  %s30_s15, 16, %s569_s24, [#allocation3 + $0x1] }
  0x3c   :  { %s47_s25 = scalar_lea.hbm %s704_s1, %s253_s16  ;;  %s255_s26 = sshll.u32 %s571_s27, 4 }
  0x3d   :  { %s340_s28 = scalar_lea.hbm %s47_s25, 16  ;;  %p343_p0 = scmp.lt.u32.totalorder %s47_s25, %s704_s1 }
  0x3e   :  { %p341_p13 = scmp.ne.s32.totalorder %s47_s25, %s340_s28  ;;  %p344_p1 = scmp.lt.u32.totalorder %s582_s8, %s340_s28 }
  0x3f   :  { %p346_p3 = scmp.lt.u32.totalorder %s340_s28, %s47_s25 }
  0x40   :  { %p345_p2 = por %p344_p1, %p343_p0 }
  0x42   :  { %p347_p4 = por %p346_p3, %p345_p2 }
  0x44   :  { %p348_p5 = pnand %p347_p4, %p341_p13 }
  0x46   :  { %351 = shalt.err (!%p348_p5)  }
  0x47   :  { %s352_s24 = scalar_lea.vmem %s573_s0, 16  ;;  %p357_p7 = scmp.lt.s32.totalorder %s573_s0, %s565_s21 }
  0x48   :  { %p353_p6 = scmp.ne.s32.totalorder %s573_s0, %s352_s24  ;;  %p358_p8 = scmp.lt.s32.totalorder %s591_s12, %s352_s24 }
  0x4a   :  { %p359_p9 = por %p358_p8, %p357_p7 }
  0x4c   :  { %p360_p10 = pnand %p359_p9, %p353_p6 }
  0x4e   :  { %363 = shalt.err (!%p360_p10)  }
  0x4f   :  { %60 = dma.hbm_to_vmem [thread:$0]  %s47_s25, 16, %s573_s0, [#allocation3 + $0x2] }
  0x50   :  { %s64_s4 = scalar_lea.hbm %s704_s1, %s255_s26  ;;  %s530_s5 = smov [#allocation2 + $0x3]  }
  0x51   :  { %s74_s6 = sshll.u32 %s530_s5, 4  ;;  %s628_s7 = sld [smem:[#allocation5 + $0x4]]  ;;  %s75_s6 = int_to_ptr.vmem [resolvable:$true] %s74_s6 }
  0x52   :  { %s364_s9 = scalar_lea.hbm %s64_s4, 16  ;;  %p367_p12 = scmp.lt.u32.totalorder %s64_s4, %s704_s1 }
  0x53   :  { %p365_p11 = scmp.ne.s32.totalorder %s64_s4, %s364_s9  ;;  %p368_p13 = scmp.lt.u32.totalorder %s582_s8, %s364_s9 }
  0x54   :  { %p370_p1 = scmp.lt.u32.totalorder %s364_s9, %s64_s4 }
  0x55   :  { %p369_p0 = por %p368_p13, %p367_p12 }
  0x57   :  { %p371_p2 = por %p370_p1, %p369_p0 }
  0x59   :  { %p372_p3 = pnand %p371_p2, %p365_p11 }
  0x5b   :  { %375 = shalt.err (!%p372_p3)  }
  0x5c   :  { %s376_s0 = scalar_lea.vmem %s75_s6, 16  ;;  %p381_p5 = scmp.lt.s32.totalorder %s75_s6, %s565_s21 }
  0x5d   :  { %p377_p4 = scmp.ne.s32.totalorder %s75_s6, %s376_s0  ;;  %p382_p6 = scmp.lt.s32.totalorder %s591_s12, %s376_s0 }
  0x5f   :  { %p383_p7 = por %p382_p6, %p381_p5 }
  0x61   :  { %p384_p8 = pnand %p383_p7, %p377_p4 }
  0x63   :  { %387 = shalt.err (!%p384_p8)  }
  0x64   :  { %77 = dma.hbm_to_vmem [thread:$0]  %s64_s4, 16, %s75_s6, [#allocation3 + $0x3] }
  0x65   :  { %s531_s13 = smov [#allocation2 + $0x4]   ;;  %s636_s15 = sld [smem:[#allocation5 + $0x5]] }
  0x66   :  { %s91_s14 = sshll.u32 %s531_s13, 4  ;;  %s532_s16 = smov [#allocation2 + $0x5]   ;;  %s92_s14 = int_to_ptr.vmem [resolvable:$true] %s91_s14 }
  0x67   :  { %s108_s17 = sshll.u32 %s532_s16, 4  ;;  %s638_s18 = sld [smem:[#allocation5 + $0x6]]  ;;  %s641_s17 = int_to_ptr.vmem [resolvable:$true] %s108_s17 }
  0x68   :  { %s257_s19 = sshll.u32 %s628_s7, 4 }
  0x69   :  { %s81_s23 = scalar_lea.hbm %s704_s1, %s257_s19 }
  0x6a   :  { %s388_s25 = scalar_lea.hbm %s81_s23, 16  ;;  %p391_p10 = scmp.lt.u32.totalorder %s81_s23, %s704_s1 }
  0x6b   :  { %p389_p9 = scmp.ne.s32.totalorder %s81_s23, %s388_s25  ;;  %p392_p11 = scmp.lt.u32.totalorder %s582_s8, %s388_s25 }
  0x6c   :  { %p394_p13 = scmp.lt.u32.totalorder %s388_s25, %s81_s23 }
  0x6d   :  { %p393_p12 = por %p392_p11, %p391_p10 }
  0x6f   :  { %p395_p0 = por %p394_p13, %p393_p12 }
  0x71   :  { %p396_p1 = pnand %p395_p0, %p389_p9 }
  0x73   :  { %399 = shalt.err (!%p396_p1)  }
  0x74   :  { %s400_s29 = scalar_lea.vmem %s92_s14, 16  ;;  %p405_p3 = scmp.lt.s32.totalorder %s92_s14, %s565_s21 }
  0x75   :  { %p401_p2 = scmp.ne.s32.totalorder %s92_s14, %s400_s29  ;;  %p406_p4 = scmp.lt.s32.totalorder %s591_s12, %s400_s29 }
  0x77   :  { %p407_p5 = por %p406_p4, %p405_p3 }
  0x79   :  { %p408_p6 = pnand %p407_p5, %p401_p2 }
  0x7b   :  { %411 = shalt.err (!%p408_p6)  }
  0x7c   :  { %94 = dma.hbm_to_vmem [thread:$0]  %s81_s23, 16, %s92_s14, [#allocation3 + $0x4] }
  0x7d   :  { %s259_s30 = sshll.u32 %s636_s15, 4  ;;  %s533_s24 = smov [#allocation2 + $0x6]  }
  0x7e   :  { %s125_s27 = sshll.u32 %s533_s24, 4  ;;  %s98_s5 = scalar_lea.hbm %s704_s1, %s259_s30  ;;  %s656_s27 = int_to_ptr.vmem [resolvable:$true] %s125_s27 }
  0x7f   :  { %s412_s6 = scalar_lea.hbm %s98_s5, 16  ;;  %p415_p8 = scmp.lt.u32.totalorder %s98_s5, %s704_s1 }
  0x80   :  { %p413_p7 = scmp.ne.s32.totalorder %s98_s5, %s412_s6  ;;  %p416_p9 = scmp.lt.u32.totalorder %s582_s8, %s412_s6 }
  0x81   :  { %p418_p11 = scmp.lt.u32.totalorder %s412_s6, %s98_s5 }
  0x82   :  { %p417_p10 = por %p416_p9, %p415_p8 }
  0x84   :  { %p419_p12 = por %p418_p11, %p417_p10 }
  0x86   :  { %p420_p13 = pnand %p419_p12, %p413_p7 }
  0x88   :  { %423 = shalt.err (!%p420_p13)  }
  0x89   :  { %s424_s10 = scalar_lea.vmem %s641_s17, 16  ;;  %p429_p1 = scmp.lt.s32.totalorder %s641_s17, %s565_s21 }
  0x8a   :  { %p425_p0 = scmp.ne.s32.totalorder %s641_s17, %s424_s10  ;;  %p430_p2 = scmp.lt.s32.totalorder %s591_s12, %s424_s10 }
  0x8c   :  { %p431_p3 = por %p430_p2, %p429_p1 }
  0x8e   :  { %p432_p4 = pnand %p431_p3, %p425_p0 }
  0x90   :  { %435 = shalt.err (!%p432_p4)  }
  0x91   :  { %111 = dma.hbm_to_vmem [thread:$0]  %s98_s5, 16, %s641_s17, [#allocation3 + $0x5] }
  0x92   :  { %s261_s11 = sshll.u32 %s638_s18, 4  ;;  %s262_s0 = sld [smem:[#allocation5 + $0x7]] }
  0x93   :  { %s115_s15 = scalar_lea.hbm %s704_s1, %s261_s11 }
  0x94   :  { %s436_s16 = scalar_lea.hbm %s115_s15, 16  ;;  %p439_p6 = scmp.lt.u32.totalorder %s115_s15, %s704_s1 }
  0x95   :  { %p437_p5 = scmp.ne.s32.totalorder %s115_s15, %s436_s16  ;;  %p440_p7 = scmp.lt.u32.totalorder %s582_s8, %s436_s16 }
  0x96   :  { %p442_p9 = scmp.lt.u32.totalorder %s436_s16, %s115_s15 }
  0x97   :  { %p441_p8 = por %p440_p7, %p439_p6 }
  0x99   :  { %p443_p10 = por %p442_p9, %p441_p8 }
  0x9b   :  { %p444_p11 = pnand %p443_p10, %p437_p5 }
  0x9d   :  { %447 = shalt.err (!%p444_p11)  }
  0x9e   :  { %s448_s17 = scalar_lea.vmem %s656_s27, 16  ;;  %p453_p13 = scmp.lt.s32.totalorder %s656_s27, %s565_s21 }
  0x9f   :  { %p449_p12 = scmp.ne.s32.totalorder %s656_s27, %s448_s17  ;;  %p454_p0 = scmp.lt.s32.totalorder %s591_s12, %s448_s17 }
  0xa1   :  { %p455_p1 = por %p454_p0, %p453_p13 }
  0xa3   :  { %p456_p2 = pnand %p455_p1, %p449_p12 }
  0xa5   :  { %459 = shalt.err (!%p456_p2)  }
  0xa6   :  { %128 = dma.hbm_to_vmem [thread:$0]  %s115_s15, 16, %s656_s27, [#allocation3 + $0x6] }
  0xa7   :  { %s534_s18 = smov [#allocation2 + $0x7]   ;;  %s263_s23 = sshll.u32 %s262_s0, 4 }
  0xa8   :  { %s142_s22 = sshll.u32 %s534_s18, 4  ;;  %s132_s28 = scalar_lea.hbm %s704_s1, %s263_s23  ;;  %s143_s22 = int_to_ptr.vmem [resolvable:$true] %s142_s22 }
  0xa9   :  { %s460_s29 = scalar_lea.hbm %s132_s28, 16  ;;  %p463_p4 = scmp.lt.u32.totalorder %s132_s28, %s704_s1 }
  0xaa   :  { %p461_p3 = scmp.ne.s32.totalorder %s132_s28, %s460_s29  ;;  %p464_p5 = scmp.lt.u32.totalorder %s582_s8, %s460_s29 }
  0xab   :  { %p466_p7 = scmp.lt.u32.totalorder %s460_s29, %s132_s28 }
  0xac   :  { %p465_p6 = por %p464_p5, %p463_p4 }
  0xae   :  { %p467_p8 = por %p466_p7, %p465_p6 }
  0xb0   :  { %p468_p9 = pnand %p467_p8, %p461_p3 }
  0xb2   :  { %471 = shalt.err (!%p468_p9)  }
  0xb3   :  { %s472_s27 = scalar_lea.vmem %s143_s22, 16  ;;  %p477_p11 = scmp.lt.s32.totalorder %s143_s22, %s565_s21 }
  0xb4   :  { %p473_p10 = scmp.ne.s32.totalorder %s143_s22, %s472_s27  ;;  %p478_p12 = scmp.lt.s32.totalorder %s591_s12, %s472_s27 }
  0xb6   :  { %p479_p13 = por %p478_p12, %p477_p11 }
  0xb8   :  { %p480_p0 = pnand %p479_p13, %p473_p10 }
  0xba   :  { %483 = shalt.err (!%p480_p0)  }
  0xbb   :  { %145 = dma.hbm_to_vmem [thread:$0]  %s132_s28, 16, %s143_s22, [#allocation3 + $0x7] }
  0xbc   :  { %508 = dma.done.wait [#allocation3], 16 }
  0xbd   :  { %509 = vsyncadd [#allocation3], 4294967280 }
  0xbe   :  { %510 = dma.done.wait [#allocation3 + $0x1], 16 }
  0xbf   :  { %511 = vsyncadd [#allocation3 + $0x1], 4294967280 }
  0xc0   :  { %512 = dma.done.wait [#allocation3 + $0x2], 16 }
  0xc1   :  { %513 = vsyncadd [#allocation3 + $0x2], 4294967280 }
  0xc2   :  { %514 = dma.done.wait [#allocation3 + $0x3], 16 }
  0xc3   :  { %515 = vsyncadd [#allocation3 + $0x3], 4294967280 }
  0xc4   :  { %516 = dma.done.wait [#allocation3 + $0x4], 16 }
  0xc5   :  { %517 = vsyncadd [#allocation3 + $0x4], 4294967280 }
  0xc6   :  { %518 = dma.done.wait [#allocation3 + $0x5], 16 }
  0xc7   :  { %519 = vsyncadd [#allocation3 + $0x5], 4294967280 }
  0xc8   :  { %520 = dma.done.wait [#allocation3 + $0x6], 16 }
  0xc9   :  { %521 = vsyncadd [#allocation3 + $0x6], 4294967280 }
  0xca   :  { %522 = dma.done.wait [#allocation3 + $0x7], 16 }
  0xcb   :  { %523 = vsyncadd [#allocation3 + $0x7], 4294967280  ;;  %s535_s1 = smov [#allocation6]   ;;  %v162_v0 = vld [vmem:[#allocation2] sm:$0xff] }
  0xcc   :  { %s170_s21 = sshll.u32 %s535_s1, 4  ;;  %163 = vst [vmem:[#allocation6] sm:$0xff] %v162_v0  ;;  %s171_s21 = int_to_ptr.vmem [resolvable:$true] %s170_s21 }
  0xcd   :  { %s484_s8 = scalar_lea.vmem %s171_s21, 128  ;;  %p489_p2 = scmp.lt.s32.totalorder %s171_s21, %s171_s21 }
  0xce   :  { %p485_p1 = scmp.ne.s32.totalorder %s171_s21, %s484_s8  ;;  %p490_p3 = scmp.lt.s32.totalorder %s484_s8, %s484_s8 }
  0xd0   :  { %p491_p4 = por %p490_p3, %p489_p2 }
  0xd2   :  { %p492_p5 = pnand %p491_p4, %p485_p1 }
  0xd4   :  { %495 = shalt.err (!%p492_p5)
}
  0xd5   :  { %s496_s4 = scalar_lea.hbm %s705_s2, 128 }
  0xd6   :  { %p497_p6 = scmp.ne.s32.totalorder %s705_s2, %s496_s4  ;;  %p500_p7 = scmp.lt.u32.totalorder %s496_s4, %s705_s2 }
  0xd8   :  { %p502_p8 = pnand %p500_p7, %p497_p6 }
  0xda   :  { %505 = shalt.err (!%p502_p8)
}
  0xdb   :  { %173 = dma.vmem_to_hbm [thread:$0]  %s171_s21, 128, %s705_s2, [#allocation7]  }
  0xdc   :  { %524 = dma.done.wait [#allocation7], 128  }
  0xdd   :  { %525 = vsyncadd [#allocation7], 4294967168 }
  0xde   :  { %177 = vsyncpa [#allocation7], 1 }
  0xdf   :  { %178 = vsyncmov [#allocation3] }
  0xe2   :  { %s179_s0 = vpop.sfrf %178 }
  0xe3   :  { %p264_p9 = scmp.ne.s32.totalorder %s179_s0, 0 }
  0xe5   :  { %183 = shalt.err (%p264_p9)  }
  0xe6   :  { %185 = vsyncmov [#allocation3 + $0x1] }
  0xe9   :  { %s186_s13 = vpop.sfrf %185 }
  0xea   :  { %p265_p10 = scmp.ne.s32.totalorder %s186_s13, 0 }
  0xec   :  { %190 = shalt.err (%p265_p10)  }
  0xed   :  { %192 = vsyncmov [#allocation3 + $0x2] }
  0xf0   :  { %s193_s14 = vpop.sfrf %192 }
  0xf1   :  { %p266_p11 = scmp.ne.s32.totalorder %s193_s14, 0 }
  0xf3   :  { %197 = shalt.err (%p266_p11)  }
  0xf4   :  { %199 = vsyncmov [#allocation3 + $0x3] }
  0xf7   :  { %s200_s15 = vpop.sfrf %199 }
  0xf8   :  { %p267_p12 = scmp.ne.s32.totalorder %s200_s15, 0 }
  0xfa   :  { %204 = shalt.err (%p267_p12)  }
  0xfb   :  { %206 = vsyncmov [#allocation3 + $0x4] }
  0xfe   :  { %s207_s2 = vpop.sfrf %206 }
  0xff   :  { %p268_p13 = scmp.ne.s32.totalorder %s207_s2, 0 }
 0x101   :  { %211 = shalt.err (%p268_p13)  }
 0x102   :  { %213 = vsyncmov [#allocation3 + $0x5] }
 0x105   :  { %s214_s16 = vpop.sfrf %213 }
 0x106   :  { %p269_p0 = scmp.ne.s32.totalorder %s214_s16, 0 }
 0x108   :  { %218 = shalt.err (%p269_p0)  }
 0x109   :  { %220 = vsyncmov [#allocation3 + $0x6] }
 0x10c   :  { %s221_s19 = vpop.sfrf %220 }
 0x10d   :  { %p270_p1 = scmp.ne.s32.totalorder %s221_s19, 0 }
 0x10f   :  { %225 = shalt.err (%p270_p1)  }
 0x110   :  { %227 = vsyncmov [#allocation3 + $0x7] }
 0x113   :  { %s228_s20 = vpop.sfrf %227 }
 0x114   :  { %p271_p2 = scmp.ne.s32.totalorder %s228_s20, 0 }
 0x116   :  { %232 = shalt.err (%p271_p2)  }

</bundles_post_ra>
